<compile_context>
chip_gen: v7x
topology: tpu7x:2x2x1
jax: 0.10.0
libtpu: 0.0.40
codegen_flags: <defaults>
</compile_context>

<pallas_src>
import functools
import math

import jax
import jax.numpy as jnp
import numpy as np
from jax.experimental import pallas as pl
from jax.experimental.pallas import tpu as pltpu


# ---------------------------------------------------------------------------
# Relative position bias (plain JAX glue — mirrors the PyTorch static method)
# ---------------------------------------------------------------------------
def _relative_position_bucket(relative_position, bidirectional=True,
                              num_buckets=32, max_distance=128):
    ret = jnp.zeros_like(relative_position)
    n = -relative_position
    if bidirectional:
        num_buckets //= 2
        ret = ret + (n < 0).astype(jnp.int32) * num_buckets
        n = jnp.abs(n)
    else:
        n = jnp.maximum(n, jnp.zeros_like(n))
    max_exact = num_buckets // 2
    is_small = n < max_exact
    val_if_large = max_exact + (
        jnp.log(n.astype(jnp.float32) / max_exact)
        / math.log(max_distance / max_exact)
        * (num_buckets - max_exact)
    ).astype(jnp.int32)
    val_if_large = jnp.minimum(val_if_large,
                               jnp.full_like(val_if_large, num_buckets - 1))
    ret = ret + jnp.where(is_small, n, val_if_large)
    return ret


def compute_bias(context_position, memory_position, rel_bias_weight,
                 num_buckets):
    # relative_position: (B, Lq, Lk)
    relative_position = (memory_position[:, None, :]
                         - context_position[:, :, None]).astype(jnp.int32)
    rp_bucket = _relative_position_bucket(relative_position,
                                          bidirectional=True,
                                          num_buckets=num_buckets)
    values = jnp.take(rel_bias_weight, rp_bucket, axis=0)   # (B, Lq, Lk, H)
    return jnp.transpose(values, (0, 3, 1, 2))               # (B, H, Lq, Lk)


# ---------------------------------------------------------------------------
# Pallas kernel: one (batch, head-group) tile per grid step
# ---------------------------------------------------------------------------
def _sdpa_kernel(q_ref, k_ref, v_ref, bias_ref, out_ref, *attn_refs,
                 inv_temperature, precision, approx_recip):
    # q_ref: (G, Lq, Dk)  k_ref: (G, Lk, Dk)  v_ref: (G, Lk, Dv)
    # bias_ref: (G or 1, Lq, Lk) — position bias with the mask folded in
    # Batched QK^T contracting on the last dim — no explicit transpose (XLU).
    scores = jax.lax.dot_general(
        q_ref[...], k_ref[...],
        dimension_numbers=(((2,), (2,)), ((0,), (0,))),
        preferred_element_type=jnp.float32,
        precision=precision)                                  # (G, Lq, Lk) f32
    scores = scores * inv_temperature + bias_ref[...].astype(jnp.float32)

    # Numerically-stable softmax in f32.
    mx = jnp.max(scores, axis=-1, keepdims=True)
    e = jnp.exp(scores - mx)
    denom = jnp.sum(e, axis=-1, keepdims=True)
    inv = pl.reciprocal(denom, approx=True) if approx_recip else 1.0 / denom
    # TODO(synk): dropout (attn_dropout=0.1) is identity here (inference mode).

    if attn_refs:   # static (trace-time) flag: attention map requested
        attn = e * inv
        attn_refs[0][...] = attn.astype(attn_refs[0].dtype)
        pv = jax.lax.dot_general(
            attn.astype(v_ref.dtype), v_ref[...],
            dimension_numbers=(((2,), (1,)), ((0,), (0,))),
            preferred_element_type=jnp.float32,
            precision=precision)                              # (G, Lq, Dv)
        out_ref[...] = pv.astype(out_ref.dtype)
    else:
        # Normalize after the PV matmul: O(Lq*Dv) multiply, no (G,Lq,Lk)
        # normalized-probability buffer kept live.
        pv = jax.lax.dot_general(
            e.astype(v_ref.dtype), v_ref[...],
            dimension_numbers=(((2,), (1,)), ((0,), (0,))),
            preferred_element_type=jnp.float32,
            precision=precision)
        out_ref[...] = (pv * inv).astype(out_ref.dtype)


# ---------------------------------------------------------------------------
# VMEM sizing / head-group selection
# ---------------------------------------------------------------------------
def _step_vmem_bytes(g, Lq, Lk, Dk, Dv, in_itemsize, out_itemsize,
                     attn_itemsize, return_attn):
    b = 2 * in_itemsize * g * (Lq * Dk + Lk * Dk + Lk * Dv + Lq * Lk)  # dbl-buffered ins
    b += 2 * out_itemsize * g * Lq * Dv                                # dbl-buffered out
    if return_attn:
        b += 2 * attn_itemsize * g * Lq * Lk
    b += 4 * g * (3 * Lq * Lk + Lq * Dv)          # f32 scores/e/attn + pv intermediates
    return b


def _pick_heads_per_step(H, Lq, Lk, Dk, Dv, *, in_itemsize, out_itemsize,
                         attn_itemsize, return_attn,
                         budget_bytes=12 * 1024 * 1024):
    """Largest divisor of H whose per-step footprint fits the VMEM budget.
    The batch grid axis supplies >=2 steps for v7x megacore, so G is never
    shrunk just to create parallelism on single-TensorCore chips."""
    best = 1
    for g in range(1, H + 1):
        if H % g:
            continue
        if _step_vmem_bytes(g, Lq, Lk, Dk, Dv, in_itemsize, out_itemsize,
                            attn_itemsize, return_attn) <= budget_bytes:
            best = g
    return best


# ---------------------------------------------------------------------------
# Wrapper
# ---------------------------------------------------------------------------
def scaled_dot_product_attention(q, k, v, position_bias=None, mask=None,
                                 temperature=1.0, *, return_attn=False,
                                 matmul_dtype=jnp.bfloat16, attn_dtype=None,
                                 heads_per_step=None):
    """q,k: (B,H,Lq,Dk)/(B,H,Lk,Dk); v: (B,H,Lk,Dv).
    position_bias / mask: broadcastable to (B,H,Lq,Lk); mask True = disallow.
    Returns (output, attn) if return_attn else output."""
    B, H, Lq, Dk = q.shape
    Lk = k.shape[2]
    Dv = v.shape[3]

    use_bf16 = np.dtype(matmul_dtype) == np.dtype(jnp.bfloat16)
    bias_dtype = jnp.bfloat16 if use_bf16 else jnp.float32
    if attn_dtype is None:
        attn_dtype = jnp.bfloat16 if use_bf16 else jnp.float32

    # Fold the mask into the additive bias, but KEEP the natural broadcast
    # shape (no host-side broadcast_to across B or H): the batch-invariant T5
    # bias is streamed from HBM once per head group, not B times.
    # NOTE: fully-masked rows would differ from torch's masked_fill semantics
    # (uniform attention); not a case this module hits.
    bias = jnp.zeros((1, 1, Lq, Lk), jnp.float32)
    if position_bias is not None:
        bias = bias + position_bias.astype(jnp.float32)
    if mask is not None:
        bias = bias + jnp.where(mask, jnp.float32(-1e9), jnp.float32(0.0))
    Bb, Hb = bias.shape[0], bias.shape[1]
    assert Bb in (1, B) and Hb in (1, H)
    bias = bias.astype(bias_dtype)

    # Stream q/k/v at matmul precision: halves the HBM reads on the bf16 path
    # (an in-kernel cast would not change DMA bytes).
    q_in = q.astype(matmul_dtype)
    k_in = k.astype(matmul_dtype)
    v_in = v.astype(matmul_dtype)

    in_itemsize = np.dtype(matmul_dtype).itemsize
    out_itemsize = np.dtype(q.dtype).itemsize
    attn_itemsize = np.dtype(attn_dtype).itemsize

    if heads_per_step is None:
        G = _pick_heads_per_step(H, Lq, Lk, Dk, Dv,
                                 in_itemsize=in_itemsize,
                                 out_itemsize=out_itemsize,
                                 attn_itemsize=attn_itemsize,
                                 return_attn=return_attn)
    else:
        G = heads_per_step
    assert H % G == 0
    Gb = G if Hb == H else 1

    vmem_est = _step_vmem_bytes(G, Lq, Lk, Dk, Dv, in_itemsize, out_itemsize,
                                attn_itemsize, return_attn)
    vmem_limit = int(min(64 * 1024 * 1024, max(32 * 1024 * 1024, 3 * vmem_est)))

    qkv_map = lambda b, h: (b, h, 0, 0)
    bias_map = lambda b, h, _bfull=(Bb == B), _hfull=(Hb == H): (
        b if _bfull else 0, h if _hfull else 0, 0, 0)

    in_specs = [
        pl.BlockSpec((None, G, Lq, Dk), qkv_map),
        pl.BlockSpec((None, G, Lk, Dk), qkv_map),
        pl.BlockSpec((None, G, Lk, Dv), qkv_map),
        pl.BlockSpec((None, Gb, Lq, Lk), bias_map),
    ]
    out_shape = [jax.ShapeDtypeStruct((B, H, Lq, Dv), q.dtype)]
    out_specs = [pl.BlockSpec((None, G, Lq, Dv), qkv_map)]
    if return_attn:
        out_shape.append(jax.ShapeDtypeStruct((B, H, Lq, Lk), attn_dtype))
        out_specs.append(pl.BlockSpec((None, G, Lq, Lk), qkv_map))

    # Exact f32 matmuls on the faithful path; fast bf16 MXU path otherwise.
    precision = (jax.lax.Precision.DEFAULT if use_bf16
                 else jax.lax.Precision.HIGHEST)

    kernel = functools.partial(_sdpa_kernel,
                               inv_temperature=float(1.0 / temperature),
                               precision=precision,
                               approx_recip=use_bf16)

    # TODO(synk): for large Lk (>~1k), switch to an Lk-tiled online-softmax
    # (flash) variant with return_attn=False to bound VMEM on v7x (64 MiB).
    # TODO(synk): lane-dense (Lq*Dv / Lq*Lk flattened) output stores and
    # pipeline_mode=pl.Buffered(3) on k/v/bias are further (secondary) levers.
    results = pl.pallas_call(
        kernel,
        out_shape=tuple(out_shape),
        grid_spec=pltpu.PrefetchScalarGridSpec(
            num_scalar_prefetch=0,
            grid=(B, H // G),
            in_specs=in_specs,
            out_specs=tuple(out_specs),
        ),
        compiler_params=pltpu.CompilerParams(
            dimension_semantics=("parallel", "parallel"),
            vmem_limit_bytes=vmem_limit),
    )(q_in, k_in, v_in, bias)

    out = results[0]
    if return_attn:
        return out, results[1]
    return out


# ---------------------------------------------------------------------------
# Pure-JAX reference (faithful to the PyTorch forward)
# ---------------------------------------------------------------------------
def reference_sdpa(q, k, v, position_bias, mask, temperature):
    attn = jnp.einsum('bhqd,bhkd->bhqk', q / temperature, k)
    attn = attn + position_bias
    attn = jnp.where(mask, -1e9, attn)
    attn = jax.nn.softmax(attn, axis=-1)
    out = jnp.einsum('bhqk,bhkd->bhqd', attn, v)
    return out, attn


if __name__ == "__main__":
    # Small shapes consistent with the module's forward
    B, H, Lq, Lk, Dk, Dv = 2, 4, 8, 8, 32, 32
    num_buckets = 32
    temperature = math.sqrt(Dk)

    key = jax.random.PRNGKey(0)
    kq, kk, kv, kw = jax.random.split(key, 4)
    q = jax.random.normal(kq, (B, H, Lq, Dk), dtype=jnp.float32)
    k = jax.random.normal(kk, (B, H, Lk, Dk), dtype=jnp.float32)
    v = jax.random.normal(kv, (B, H, Lk, Dv), dtype=jnp.float32)

    # nn.Embedding(num_buckets, n_heads) weights ~ N(0, 1)
    rel_bias_weight = jax.random.normal(kw, (num_buckets, H),
                                        dtype=jnp.float32)

    # Positions are batch-invariant: compute the bias with batch dim 1 and let
    # the BlockSpec index_map broadcast it across the batch grid axis.
    context_position = jnp.arange(Lq)[None, :]
    memory_position = jnp.arange(Lk)[None, :]
    position_bias = compute_bias(context_position, memory_position,
                                 rel_bias_weight, num_buckets)  # (1,H,Lq,Lk)

    # causal mask: True where attention is disallowed (masked_fill semantics).
    causal = jnp.triu(jnp.ones((Lq, Lk), dtype=bool), k=1)
    mask = causal[None, None]                                   # (1,1,Lq,Lk)

    out_ref, attn_ref = reference_sdpa(q, k, v, position_bias, mask,
                                       temperature)

    # 1) default fast path: bf16 operands, no attention-map writeback.
    out_fast = scaled_dot_product_attention(q, k, v, position_bias, mask,
                                            temperature)
    out_fast = jax.block_until_ready(out_fast)
    assert np.allclose(np.asarray(out_fast), np.asarray(out_ref),
                       atol=3e-2, rtol=3e-2)

    # 2) bf16 path with attention probabilities (bf16 attn stream).
    out_bf, attn_bf = scaled_dot_product_attention(q, k, v, position_bias,
                                                   mask, temperature,
                                                   return_attn=True)
    jax.block_until_ready((out_bf, attn_bf))
    assert np.allclose(np.asarray(out_bf), np.asarray(out_ref),
                       atol=3e-2, rtol=3e-2)
    assert np.allclose(np.asarray(attn_bf.astype(jnp.float32)),
                       np.asarray(attn_ref), atol=3e-2, rtol=3e-2)

    # 3) f32-faithful path: HIGHEST-precision matmuls + exact softmax divide.
    out32, attn32 = scaled_dot_product_attention(
        q, k, v, position_bias, mask, temperature,
        return_attn=True, matmul_dtype=jnp.float32, attn_dtype=jnp.float32)
    jax.block_until_ready((out32, attn32))
    assert np.allclose(np.asarray(out32), np.asarray(out_ref),
                       atol=2e-3, rtol=2e-3)
    assert np.allclose(np.asarray(attn32), np.asarray(attn_ref),
                       atol=2e-3, rtol=2e-3)

    print("KERNEL_OK")
</pallas_src>

<mosaic_0001>
module attributes {stable_mosaic.version = 11 : i64} {
  func.func @_sdpa_kernel(%arg0: i32, %arg1: i32, %arg2: memref<1x4x8x32xbf16, #tpu.memory_space<vmem>>, %arg3: memref<1x4x8x32xbf16, #tpu.memory_space<vmem>>, %arg4: memref<1x4x8x32xbf16, #tpu.memory_space<vmem>>, %arg5: memref<1x4x8x8xbf16, #tpu.memory_space<vmem>>, %arg6: memref<1x4x8x32xf32, #tpu.memory_space<vmem>>) attributes {dimension_semantics = [#tpu.dimension_semantics<parallel>, #tpu.dimension_semantics<parallel>], iteration_bounds = array<i64: 2, 1>, scalar_prefetch = 0 : i64, scratch_operands = 0 : i64, tpu.core_type = #tpu.core_type<tc>, window_params = [{transform_indices = @transform_0, window_bounds = array<i64: 1, 4, 8, 32>}, {transform_indices = @transform_1, window_bounds = array<i64: 1, 4, 8, 32>}, {transform_indices = @transform_2, window_bounds = array<i64: 1, 4, 8, 32>}, {transform_indices = @transform_3, window_bounds = array<i64: 1, 4, 8, 8>}, {transform_indices = @transform_4, window_bounds = array<i64: 1, 4, 8, 32>}]} {
    %c0 = arith.constant 0 : index
    %c0_0 = arith.constant 0 : index
    %c0_1 = arith.constant 0 : index
    %c0_2 = arith.constant 0 : index
    %0 = vector.load %arg2[%c0, %c0_0, %c0_1, %c0_2] : memref<1x4x8x32xbf16, #tpu.memory_space<vmem>>, vector<1x4x8x32xbf16>
    %1 = vector.shape_cast %0 : vector<1x4x8x32xbf16> to vector<4x8x32xbf16>
    %c0_3 = arith.constant 0 : index
    %c0_4 = arith.constant 0 : index
    %c0_5 = arith.constant 0 : index
    %c0_6 = arith.constant 0 : index
    %2 = vector.load %arg3[%c0_3, %c0_4, %c0_5, %c0_6] : memref<1x4x8x32xbf16, #tpu.memory_space<vmem>>, vector<1x4x8x32xbf16>
    %3 = vector.shape_cast %2 : vector<1x4x8x32xbf16> to vector<4x8x32xbf16>
    %cst = arith.constant dense<0.000000e+00> : vector<4x8x8xf32>
    %4 = tpu.matmul %1, %3, %cst {dimension_numbers = #tpu.dot_dimension_numbers<[2], [2], [1], [1], [0, 0, 0, 1, 1, 1], [0], [0]>} : vector<4x8x32xbf16>, vector<4x8x32xbf16>, vector<4x8x8xf32> -> vector<4x8x8xf32>
    %cst_7 = arith.constant 0.176776692 : f32
    %5 = vector.broadcast %cst_7 : f32 to vector<4x8x8xf32>
    %6 = arith.mulf %4, %5 : vector<4x8x8xf32>
    %c0_8 = arith.constant 0 : index
    %c0_9 = arith.constant 0 : index
    %c0_10 = arith.constant 0 : index
    %c0_11 = arith.constant 0 : index
    %7 = vector.load %arg5[%c0_8, %c0_9, %c0_10, %c0_11] : memref<1x4x8x8xbf16, #tpu.memory_space<vmem>>, vector<1x4x8x8xbf16>
    %8 = vector.shape_cast %7 : vector<1x4x8x8xbf16> to vector<4x8x8xbf16>
    %9 = arith.extf %8 : vector<4x8x8xbf16> to vector<4x8x8xf32>
    %10 = arith.addf %6, %9 : vector<4x8x8xf32>
    %cst_12 = arith.constant dense<0xFF800000> : vector<4x8xf32>
    %11 = vector.multi_reduction <maximumf>, %10, %cst_12 [2] : vector<4x8x8xf32> to vector<4x8xf32>
    %12 = vector.shape_cast %11 : vector<4x8xf32> to vector<4x8x1xf32>
    %13 = vector.broadcast %12 : vector<4x8x1xf32> to vector<4x8x8xf32>
    %14 = arith.subf %10, %13 : vector<4x8x8xf32>
    %15 = math.exp %14 : vector<4x8x8xf32>
    %cst_13 = arith.constant dense<0.000000e+00> : vector<4x8xf32>
    %16 = vector.multi_reduction <add>, %15, %cst_13 [2] : vector<4x8x8xf32> to vector<4x8xf32>
    %17 = vector.shape_cast %16 : vector<4x8xf32> to vector<4x8x1xf32>
    %18 = tpu.reciprocal %17 {approx = true} : vector<4x8x1xf32> -> vector<4x8x1xf32>
    %19 = arith.truncf %15 : vector<4x8x8xf32> to vector<4x8x8xbf16>
    %c0_14 = arith.constant 0 : index
    %c0_15 = arith.constant 0 : index
    %c0_16 = arith.constant 0 : index
    %c0_17 = arith.constant 0 : index
    %20 = vector.load %arg4[%c0_14, %c0_15, %c0_16, %c0_17] : memref<1x4x8x32xbf16, #tpu.memory_space<vmem>>, vector<1x4x8x32xbf16>
    %21 = vector.shape_cast %20 : vector<1x4x8x32xbf16> to vector<4x8x32xbf16>
    %cst_18 = arith.constant dense<0.000000e+00> : vector<4x8x32xf32>
    %22 = tpu.matmul %19, %21, %cst_18 {dimension_numbers = #tpu.dot_dimension_numbers<[2], [1], [1], [2], [0, 0, 0, 1, 1, 2], [0], [0]>} : vector<4x8x8xbf16>, vector<4x8x32xbf16>, vector<4x8x32xf32> -> vector<4x8x32xf32>
    %23 = vector.broadcast %18 : vector<4x8x1xf32> to vector<4x8x32xf32>
    %24 = arith.mulf %22, %23 : vector<4x8x32xf32>
    %c0_19 = arith.constant 0 : index
    %c0_20 = arith.constant 0 : index
    %c0_21 = arith.constant 0 : index
    %c0_22 = arith.constant 0 : index
    %25 = vector.load %arg6[%c0_19, %c0_20, %c0_21, %c0_22] : memref<1x4x8x32xf32, #tpu.memory_space<vmem>>, vector<1x4x8x32xf32>
    %26 = vector.shape_cast %25 : vector<1x4x8x32xf32> to vector<4x8x32xf32>
    %27 = vector.shape_cast %24 : vector<4x8x32xf32> to vector<1x4x8x32xf32>
    tpu.vector_store %arg6[%c0_19, %c0_20, %c0_21, %c0_22], %27 {strides = array<i32>} : memref<1x4x8x32xf32, #tpu.memory_space<vmem>>, vector<1x4x8x32xf32>,
    return
  }
  func.func @transform_0(%arg0: i32, %arg1: i32) -> (i32, i32, i32, i32) {
    %c0_i32 = arith.constant 0 : i32
    %c0_i32_0 = arith.constant 0 : i32
    %c0_i32_1 = arith.constant 0 : i32
    return %arg0, %arg1, %c0_i32, %c0_i32_0 : i32, i32, i32, i32
  }
  func.func @transform_1(%arg0: i32, %arg1: i32) -> (i32, i32, i32, i32) {
    %c0_i32 = arith.constant 0 : i32
    %c0_i32_0 = arith.constant 0 : i32
    %c0_i32_1 = arith.constant 0 : i32
    return %arg0, %arg1, %c0_i32, %c0_i32_0 : i32, i32, i32, i32
  }
  func.func @transform_2(%arg0: i32, %arg1: i32) -> (i32, i32, i32, i32) {
    %c0_i32 = arith.constant 0 : i32
    %c0_i32_0 = arith.constant 0 : i32
    %c0_i32_1 = arith.constant 0 : i32
    return %arg0, %arg1, %c0_i32, %c0_i32_0 : i32, i32, i32, i32
  }
  func.func @transform_3(%arg0: i32, %arg1: i32) -> (i32, i32, i32, i32) {
    %c0_i32 = arith.constant 0 : i32
    %c0_i32_0 = arith.constant 0 : i32
    %c0_i32_1 = arith.constant 0 : i32
    %c0_i32_2 = arith.constant 0 : i32
    return %c0_i32, %arg1, %c0_i32_0, %c0_i32_1 : i32, i32, i32, i32
  }
  func.func @transform_4(%arg0: i32, %arg1: i32) -> (i32, i32, i32, i32) {
    %c0_i32 = arith.constant 0 : i32
    %c0_i32_0 = arith.constant 0 : i32
    %c0_i32_1 = arith.constant 0 : i32
    return %arg0, %arg1, %c0_i32, %c0_i32_0 : i32, i32, i32, i32
  }
}

</mosaic_0001>

<bundles_post_ra>
// kernel: tpu_custom_call.1
= control target key start
LH: loop header
LB: loop body
LE: loop exit
PB: predicated region body
PF: predicated region fallthrough
CT: control target
= control target key end

     0   :  { %s1803_s0 = inlined_call_operand.hbm [shape: bf16[2,4,8,32], index: 0, kind: input, shape index: {}]   ;;  %s1804_s1 = inlined_call_operand.hbm [shape: bf16[2,4,8,32], index: 1, kind: input, shape index: {}]   ;;  %s1805_s2 = inlined_call_operand.hbm [shape: bf16[2,4,8,32], index: 2, kind: input, shape index: {}]   ;;  %s1806_s3 = inlined_call_operand.hbm [shape: bf16[1,4,8,8], index: 3, kind: input, shape index: {}]   ;;  %s1807_s4 = inlined_call_operand.hbm [shape: f32[2,4,8,32], index: 4, kind: output, shape index: {}]  }
   0x1   :  { %1825 = sst [smem:[#allocation19_spill]] %s1803_s0 }
   0x2   :  { %1826 = sst [smem:[#allocation20_spill]] %s1804_s1 }
   0x3   :  { %9 = vsyncpa [#allocation3], 0 }
   0x4   :  { %11 = vsyncpa [#allocation3 + $0x1], 0 }
   0x5   :  { %12 = vsyncpa [#allocation6], 0 }
   0x6   :  { %14 = vsyncpa [#allocation6 + $0x1], 0 }
   0x7   :  { %15 = vsyncpa [#allocation9], 0 }
   0x8   :  { %16 = vsyncpa [#allocation4], 0 }
   0x9   :  { %18 = vsyncpa [#allocation4 + $0x1], 0  ;;  %s1424_s15 = smov 0   ;;  %s1426_s16 = smov 0  }
   0xa   :  { %s1428_s17 = smov 0   ;;  %s1430_s18 = smov 0  }
   0xb   :  { %s1432_s19 = smov 0   ;;  %s1434_s20 = smov 0  }
   0xc LB: > { %1827 = sst [smem:[#allocation15_spill]] %s1374_s17  ;;  %s36_s21 = sadd.s32 1, %s1382_s19  ;;  %s1386_s20 = sphi %s1434_s20, %s24_s20   ;;  %s1382_s19 = sphi %s1432_s19, %s1857_s19   ;;  %s1378_s18 = sphi %s1430_s18, %s1856_s18   ;;  %s1374_s17 = sphi %s1428_s17, %s1855_s17   ;;  %s1370_s16 = sphi %s1426_s16, %s1859_s16   ;;  %s1366_s15 = sphi %s1424_s15, %s1858_s15  }
   0xd   : > { %1828 = sst [smem:[#allocation16_spill]] %s1382_s19  ;;  %s45_s22 = sadd.s32 1, %s1374_s17 }
   0xe   : > { %p38_p0 = scmp.ge.s32.totalorder %s36_s21, 2  ;;  %p1808_p1 = scmp.ne.s32.totalorder %s1374_s17, %s1370_s16 }
   0xf   : > { %p53_p2 = scmp.eq.s32.totalorder %s1386_s20, 0  ;;  %p1104_p6 = scmp.lt.s32.totalorder %s1386_s20, 2 }
  0x10   : > { %s1861_s21 = smov (%p38_p0, %s36_s21), 0  ;;  %s1813_s24 = sand.u32 1, %s1374_s17  }
  0x11   : > { %1829 = sst [smem:[#allocation17_spill]] %s1861_s21  ;;  %p54_p3 = por %p53_p2, %p1808_p1 }
  0x12   : > { %s40_s23 = ssub.s32 %s1382_s19, %s1861_s21  ;;  %s1470_s25 = sshll.u32 %s1382_s19, 8 }
  0x13   : > { %p43_p5 = scmp.eq.s32.totalorder %s40_s23, 0  ;;  %s1477_s27 = sshll.u32 %s1813_s24, 4 }
  0x14   : > { %p1479_p7 = pnand %p1104_p6, %p54_p3  ;;  %s231_s29 = sand.u32 1, %s1386_s20  }
  0x15   : > { %s1473_s26 = scalar_select %p43_p5, %s1374_s17, %s45_s22  }
  0x16   : > { %s1831_s28 = scalar_select %p1479_p7, 1, 0 }
  0x17   : > { %1830 = sst [smem:[#allocation18_spill]] %s1473_s26  ;;  %s1832_s1 = sld [smem:[#allocation20_spill]] }
  0x18   : > { %s235_s7 = scalar_lea.vmem [#allocation5], %s1477_s27  ;;  %s1493_s9 = scalar_lea.sflag [#allocation6], %s231_s29 }
  0x19   : > { %s244_s8 = sshll.u32 %s235_s7, 4  ;;  %p1499_p9 = pneg %p1479_p7  ;;  %s1491_s8 = int_to_ptr.vmem [resolvable:$true] %s244_s8 }
  0x1b   : > { %s1833_s11 = scalar_select %p1499_p9, 1, 0 }
  0x1d   : > { %s1488_s6 = scalar_lea.hbm %s1832_s1, %s1470_s25  ;;  %s1183_s14 = scalar_lea.hbm %s1832_s1, 512 }
  0x1e   : > { %s1178_s10 = scalar_lea.hbm %s1488_s6, 256  ;;  %p1184_p12 = scmp.lt.u32.totalorder %s1488_s6, %s1832_s1 }
  0x1f   : > { %p1179_p8 = scmp.ne.s32.totalorder %s1488_s6, %s1178_s10  ;;  %p1185_p13 = scmp.lt.u32.totalorder %s1183_s14, %s1178_s10 }
  0x20   : > { %p1187_p2 = scmp.lt.u32.totalorder %s1178_s10, %s1488_s6 }
  0x21   : > { %p1181_p10 = pnand %p1499_p9, %p1179_p8  ;;  %p1186_p0 = por %p1185_p13, %p1184_p12 }
  0x23   : > { %p1182_p11 = pneg %p1181_p10  ;;  %p1188_p3 = por %p1187_p2, %p1186_p0 }
  0x25   : > { %p1189_p5 = pnand %p1188_p3, %p1182_p11 }
  0x27   : > { %1192 = shalt.err (!%p1189_p5)
}
  0x28   : > { %s1193_s29 = scalar_lea.vmem %s1491_s8, 256  ;;  %s1388_s30 = smov [#allocation5]  }
  0x29   : > { %p1194_p6 = scmp.ne.s32.totalorder %s1491_s8, %s1193_s29  ;;  %s1198_s5 = sshll.u32 %s1388_s30, 4  ;;  %s1199_s5 = int_to_ptr.vmem [resolvable:$false] %s1198_s5 }
  0x2a   : > { %s1200_s7 = scalar_lea.vmem %s1199_s5, 512  ;;  %p1201_p4 = scmp.lt.s32.totalorder %s1491_s8, %s1199_s5 }
  0x2b   : > { %p1196_p8 = pnand %p1194_p6, %p1499_p9  ;;  %p1202_p1 = scmp.lt.s32.totalorder %s1200_s7, %s1193_s29 }
  0x2d   : > { %p1197_p10 = pneg %p1196_p8  ;;  %p1203_p12 = por %p1202_p1, %p1201_p4 }
  0x2f   : > { %p1204_p13 = pnand %p1203_p12, %p1197_p10 }
  0x31   : > { %1207 = shalt.err (!%p1204_p13)
}
  0x32   : > { %s1809_s10 = smov 64   ;;  %s1811_s12 = smov 4  }
  0x33   : > { %1095 = dma.hbm_to_vmem [thread:$0]  (!%p1479_p7), %s1488_s6, 256, %s1491_s8, %s1493_s9, %s1809_s10, %s1809_s10, %s1811_s12  }
  0x34   : > { %s1527_s13 = sadd.s32 4294967295, %s1386_s20   ;;  %s964_s14 = sadd.s32 4294967294, %s1386_s20  }
  0x35   : > { %p58_p1 = scmp.ne.s32.totalorder %s1370_s16, %s1366_s15  ;;  %p1816_p4 = scmp.eq.s32.totalorder %s1527_s13, 0 }
  0x36   : > { %p166_p11 = scmp.eq.s32.totalorder %s1527_s13, 1  ;;  %p172_p0 = scmp.eq.s32.totalorder %s964_s14, 1 }
  0x37   : > { %p965_p2 = scmp.ge.s32.totalorder %s1386_s20, 1  ;;  %p1537_p3 = por %p1816_p4, %p58_p1 }
  0x38   : > { %p1835_p5 = scmp.ne.s32.totalorder %s1374_s17, %s1370_s16  ;;  %p1548_p8 = por %p172_p0, %p58_p1 }
  0x39   : > { %s1834_s22 = scalar_select %p1537_p3, 1, 0 }
  0x3a   : > { %p1544_p6 = por %p166_p11, %p1835_p5  ;;  %p179_p10 = scmp.lt.s32.totalorder %s1386_s20, 3 }
  0x3b   : > { %s1837_s8 = scalar_select %p1548_p8, 1, 0 }
  0x3c   : > { %s1836_s6 = scalar_select %p1544_p6, 1, 0 }
  0x3d   : > { %p1553_p12 = pnand %p965_p2, %p179_p10  ;;  %s1391_s29 = smov [#allocation8]  }
  0x3e   : > { %s194_s30 = sshll.u32 %s1391_s29, 4  ;;  %s1839_s0 = sld [smem:[#allocation19_spill]]  ;;  %s1557_s30 = int_to_ptr.vmem [resolvable:$true] %s194_s30 }
  0x3f   : > { %s1838_s23 = scalar_select %p1553_p12, 1, 0 }
  0x40   : > { %p1085_p13 = pneg %p1553_p12  ;;  %s212_s10 = scalar_lea.vmem [#allocation2], %s1477_s27 }
  0x41   : > { %s221_s12 = sshll.u32 %s212_s10, 4  ;;  %s1841_s29 = sand.u32 1, %s1374_s17   ;;  %s1574_s12 = int_to_ptr.vmem [resolvable:$true] %s221_s12 }
  0x42   : > { %p1570_p1 = pnand %p1085_p13, %p1816_p4  ;;  %s1578_s1 = scalar_lea.sflag [#allocation3], %s1841_s29 }
  0x44   : > { %s1565_s14 = scalar_lea.hbm %s1839_s0, %s1470_s25  ;;  %s1213_s19 = scalar_lea.hbm %s1839_s0, 512 }
  0x45   : > { %s1840_s24 = scalar_select %p1570_p1, 1, 0 }
  0x46   : > { %s1208_s21 = scalar_lea.hbm %s1565_s14, 256  ;;  %p1214_p5 = scmp.lt.u32.totalorder %s1565_s14, %s1839_s0 }
  0x47   : > { %p1209_p11 = scmp.ne.s32.totalorder %s1565_s14, %s1208_s21  ;;  %p1215_p10 = scmp.lt.u32.totalorder %s1213_s19, %s1208_s21 }
  0x48   : > { %p1217_p4 = scmp.lt.u32.totalorder %s1208_s21, %s1565_s14 }
  0x49   : > { %p1211_p0 = pnand %p1209_p11, %p1499_p9  ;;  %p1216_p13 = por %p1215_p10, %p1214_p5 }
  0x4b   : > { %p1212_p2 = pneg %p1211_p0  ;;  %p1218_p8 = por %p1217_p4, %p1216_p13 }
  0x4d   : > { %p1219_p6 = pnand %p1218_p8, %p1212_p2 }
  0x4f   : > { %1222 = shalt.err (!%p1219_p6)
}
  0x50   : > { %s1223_s29 = scalar_lea.vmem %s1574_s12, 256  ;;  %s1392_s5 = smov [#allocation2]  }
  0x51   : > { %p1224_p11 = scmp.ne.s32.totalorder %s1574_s12, %s1223_s29  ;;  %s1228_s7 = sshll.u32 %s1392_s5, 4  ;;  %s1229_s7 = int_to_ptr.vmem [resolvable:$false] %s1228_s7 }
  0x52   : > { %s1230_s26 = scalar_lea.vmem %s1229_s7, 512  ;;  %p1231_p12 = scmp.lt.s32.totalorder %s1574_s12, %s1229_s7 }
  0x53   : > { %p1226_p0 = pnand %p1224_p11, %p1499_p9  ;;  %p1232_p1 = scmp.lt.s32.totalorder %s1230_s26, %s1223_s29 }
  0x55   : > { %p1227_p3 = pneg %p1226_p0  ;;  %p1233_p5 = por %p1232_p1, %p1231_p12 }
  0x57   : > { %p1234_p10 = pnand %p1233_p5, %p1227_p3 }
  0x59   : > { %1237 = shalt.err (!%p1234_p10)
}
  0x5a   : > { %s1842_s19 = smov 4   ;;  %s1843_s21 = smov 64  }
  0x5b   : > { %1092 = dma.hbm_to_vmem [thread:$0]  (!%p1479_p7), %s1565_s14, 256, %s1574_s12, %s1578_s1, %s1843_s21, %s1843_s21, %s1842_s19  }
  0x5c   : > { %s1238_s5 = scalar_lea.hbm %s1806_s3, 256  ;;  %p1844_p3 = scmp.ne.s32.totalorder %s1840_s24, 0 }
  0x5d   : > { %p1239_p4 = scmp.ne.s32.totalorder %s1806_s3, %s1238_s5  ;;  %p1245_p1 = scmp.lt.u32.totalorder %s1238_s5, %s1806_s3 }
  0x5e   : > { %p1240_p6 = pneg %p1844_p3 }
  0x60   : > { %p1241_p8 = pnand %p1240_p6, %p1239_p4 }
  0x62   : > { %p1242_p12 = pneg %p1241_p8 }
  0x64   : > { %p1247_p2 = pnand %p1245_p1, %p1242_p12 }
  0x66   : > { %1250 = shalt.err (!%p1247_p2)
}
  0x67   : > { %s1251_s1 = scalar_lea.vmem %s1557_s30, 256  ;;  %p1259_p5 = scmp.lt.s32.totalorder %s1557_s30, %s1557_s30 }
  0x68   : > { %p1252_p13 = scmp.ne.s32.totalorder %s1557_s30, %s1251_s1  ;;  %p1260_p10 = scmp.lt.s32.totalorder %s1251_s1, %s1251_s1 }
  0x6a   : > { %p1254_p11 = pnand %p1252_p13, %p1240_p6  ;;  %p1261_p7 = por %p1260_p10, %p1259_p5 }
  0x6c   : > { %p1255_p0 = pneg %p1254_p11 }
  0x6e   : > { %p1262_p9 = pnand %p1261_p7, %p1255_p0 }
  0x70   : > { %1265 = shalt.err (!%p1262_p9)
}
  0x71   : > { %1088 = dma.hbm_to_vmem [thread:$0]  (!%p1844_p3), %s1806_s3, 256, %s1557_s30, [#allocation9], %s1843_s21, %s1843_s21, %s1842_s19  }
  0x72   : > { %s1633_s10 = scalar_lea.hbm %s1805_s2, %s1470_s25  ;;  %s258_s24 = scalar_lea.vmem [#allocation7], %s1477_s27 }
  0x73   : > { %s267_s5 = sshll.u32 %s258_s24, 4  ;;  %s1266_s7 = scalar_lea.hbm %s1633_s10, 256  ;;  %s1636_s5 = int_to_ptr.vmem [resolvable:$true] %s267_s5 }
  0x74   : > { %p1267_p7 = scmp.ne.s32.totalorder %s1633_s10, %s1266_s7  ;;  %p1845_p9 = scmp.ne.s32.totalorder %s1833_s11, 0 }
  0x75   : > { %s1271_s26 = scalar_lea.hbm %s1805_s2, 512  ;;  %p1272_p3 = scmp.lt.u32.totalorder %s1633_s10, %s1805_s2 }
  0x76   : > { %p1269_p4 = pnand %p1267_p7, %p1845_p9  ;;  %p1273_p8 = scmp.lt.u32.totalorder %s1271_s26, %s1266_s7 }
  0x77   : > { %p1275_p1 = scmp.lt.u32.totalorder %s1266_s7, %s1633_s10 }
  0x78   : > { %p1270_p6 = pneg %p1269_p4  ;;  %p1274_p12 = por %p1273_p8, %p1272_p3 }
  0x7a   : > { %p1276_p2 = por %p1275_p1, %p1274_p12 }
  0x7c   : > { %p1277_p13 = pnand %p1276_p2, %p1270_p6 }
  0x7e   : > { %1280 = shalt.err (!%p1277_p13)
}
  0x7f   : > { %s1281_s27 = scalar_lea.vmem %s1636_s5, 256  ;;  %s1393_s0 = smov [#allocation7]  }
  0x80   : > { %p1282_p11 = scmp.ne.s32.totalorder %s1636_s5, %s1281_s27  ;;  %s1286_s17 = sshll.u32 %s1393_s0, 4  ;;  %s1287_s17 = int_to_ptr.vmem [resolvable:$false] %s1286_s17 }
  0x81   : > { %s1288_s12 = scalar_lea.vmem %s1287_s17, 512  ;;  %p1289_p10 = scmp.lt.s32.totalorder %s1636_s5, %s1287_s17 }
  0x82   : > { %p1284_p0 = pnand %p1282_p11, %p1845_p9  ;;  %p1290_p7 = scmp.lt.s32.totalorder %s1288_s12, %s1281_s27 }
  0x84   : > { %p1285_p5 = pneg %p1284_p0  ;;  %p1291_p4 = por %p1290_p7, %p1289_p10 }
  0x86   : > { %p1292_p3 = pnand %p1291_p4, %p1285_p5 }
  0x88   : > { %1295 = shalt.err (!%p1292_p3)
}
  0x89   : > { %p1846_p6 = scmp.ne.s32.totalorder %s1831_s28, 0  ;;  %p1847_p9 = scmp.ne.s32.totalorder %s1838_s23, 0 }
  0x8a   : > { %s1666_s11 = sand.u32 (!%p1847_p9), 1, %s1370_s16   ;;  %p1848_p8 = scmp.ne.s32.totalorder (!%p1847_p9), %s1834_s22, 0 }
  0x8b   : > { %1098 = dma.hbm_to_vmem [thread:$0]  (!%p1846_p6), %s1633_s10, 256, %s1636_s5, %s1493_s9, %s1843_s21, %s1843_s21, %s1842_s19  }
  0x8c   : > { %279 = sbr.rel (%p1847_p9) target bundleno = 781 (0x30d), region = 36  ;;  %s978_s14 = sshll.u32 (!%p1847_p9), %s1666_s11, 4 }
  0x8d   : > { %s282_s24 = scalar_lea.sflag (!%p1847_p9), [#allocation3], %s1666_s11  ;;  %s1670_s7 = scalar_lea.vmem (!%p1847_p9), [#allocation2], %s978_s14 }
  0x93   : > { %1349 = dma.done.wait (%p1848_p8), %s282_s24, 256  }
  0x94   : > { %1351 = vsyncadd (%p1848_p8), %s282_s24, 4294967040  ;;  %s290_s28 = sand.u32 1, %s1527_s13   ;;  %s294_s23 = scalar_lea.vmem [#allocation5], %s978_s14 }
  0x95   : > { %s291_s9 = scalar_lea.sflag [#allocation6], %s290_s28 }
  0x96   : > { %1353 = dma.done.wait (%p1848_p8), %s291_s9, 512  }
  0x97   : > { %1355 = vsyncadd (%p1848_p8), %s291_s9, 4294966784  ;;  %s1681_s19 = scalar_lea.vmem [#allocation7], %s978_s14  ;;  %p1849_p12 = scmp.eq.s32.totalorder %s1527_s13, 0 }
  0x99   : > { %1357 = dma.done.wait (%p1849_p12), [#allocation9], 256   ;;  %p1850_p1 = pmov %p1849_p12 }
  0x9a   : > { %v1394_v0 = vmov 0.0   ;;  %vm1395_vm0 = vmmov 0   ;;  %vm356_vm1 = vcmask 261120   ;;  %v352_v1 = vld [vmem:[%s294_s23] sm:$0xf]  ;;  %vm557_vm2 = vcmask 64512  }
  0x9b   : > { %1359 = vsyncadd (%p1850_p1), [#allocation9], 4294967040  ;;  %1025 = vmatprep.subr.bf16.mxu0 %v1394_v0  ;;  %1031 = vmatprep.subr.bf16.mxu1 %v1394_v0  ;;  %v353_v2 = vld [vmem:[%s294_s23 + $0x4] sm:$0xf]  ;;  %v361_v3 = vsel %vm356_vm1, %v352_v1, 0  ;;  %v1008_v28 = vld [vmem:[#allocation8 + $0x8] sm:$0xff]  }
  0x9c   : > { %1027 = vmatprep.mubr.msk.bf16.mxu0 %vm1395_vm0, %v1394_v0  ;;  %1033 = vmatprep.mubr.msk.bf16.mxu1 %vm1395_vm0, %v1394_v0  ;;  %v407_v4 = vsel %vm356_vm1, %v353_v2, 0  ;;  %v354_v5 = vld [vmem:[%s294_s23 + $0x8] sm:$0xf]  ;;  %v355_v6 = vld [vmem:[%s294_s23 + $0xc] sm:$0xf]  ;;  %v1001_v13 = vld [vmem:[#allocation8] sm:$0xff]   ;;  %v1006_v31 = vunpack.c.l.bf16 %v1008_v28  ;;  %v1007_v32 = vunpack.c.h.bf16 %v1008_v28 }
  0x9d   : > { %1026 = vmatpush3.bf16.xpose.msra.mxu0 %v361_v3  ;;  %1032 = vmatpush3.bf16.xpose.msra.mxu1 %v407_v4  ;;  %v348_v7 = vld [vmem:[%s1670_s7] sm:$0xf]  ;;  %v349_v8 = vld [vmem:[%s1670_s7 + $0x4] sm:$0xf]  ;;  %v453_v9 = vsel %vm356_vm1, %v354_v5, 0  ;;  %v499_v10 = vsel %vm356_vm1, %v355_v6, 0  ;;  %v1002_v14 = vunpack.c.l.bf16 %v1001_v13  ;;  %v1003_v15 = vunpack.c.h.bf16 %v1001_v13 }
  0x9e   : > { %1037 = vmatprep.subr.bf16.mxu0 %v1394_v0  ;;  %1043 = vmatprep.subr.bf16.mxu1 %v1394_v0  ;;  %v350_v11 = vld [vmem:[%s1670_s7 + $0x8] sm:$0xf]  ;;  %v351_v12 = vld [vmem:[%s1670_s7 + $0xc] sm:$0xf]  ;;  %v602_v47 = vld [vmem:[%s1681_s19] sm:$0xf] }
  0x9f   : > { %vm609_vm3 = vcmask 1043456   ;;  %v603_v49 = vld [vmem:[%s1681_s19 + $0x4] sm:$0xf]  ;;  %v604_v62 = vld [vmem:[%s1681_s19 + $0x8] sm:$0xf]  ;;  %s982_s13 = sshll.u32 %s1666_s11, 5 }
  0xa0   : > { %v611_v48 = vsel %vm609_vm3, %v602_v47, 0  ;;  %v657_v50 = vsel %vm609_vm3, %v603_v49, 0  ;;  %v703_v4 = vsel %vm609_vm3, %v604_v62, 0  ;;  %v605_v5 = vld [vmem:[%s1681_s19 + $0xc] sm:$0xf]  ;;  %s341_s22 = scalar_lea.vmem [#allocation10], %s982_s13 }
  0xa1   : > { %s815_s21 = sshll.u32 %s341_s22, 4  ;;  %s999_s10 = sshll.u32 %s1378_s18, 9  ;;  %s1747_s21 = int_to_ptr.vmem [resolvable:$true] %s815_s21 }
  0xa2   : > { %s1753_s30 = scalar_lea.hbm %s1807_s4, %s999_s10  ;;  %s800_s18 = scalar_lea.sflag [#allocation4], %s1666_s11 }
  0xa3   : > { %s1296_s26 = scalar_lea.vmem %s1747_s21, 512  ;;  %p1851_p13 = scmp.ne.s32.totalorder %s1836_s6, 0 }
  0xa4   : > { %1028 = vmatmul.mubr.msk.bf16.vlgmr.msra.gmra.mrb[0].mxu0 %vm356_vm1, %v348_v7  ;;  %1034 = vmatmul.mubr.msk.bf16.vlgmr.msra.gmra.mrb[0].mxu1 %vm356_vm1, %v349_v8  ;;  %p1297_p2 = scmp.ne.s32.totalorder %s1747_s21, %s1296_s26  ;;  %s1396_s1 = smov [#allocation10]  }
  0xa5   : > { %1038 = vmatpush3.bf16.xpose.msra.mxu0 %v453_v9  ;;  %1044 = vmatpush3.bf16.xpose.msra.mxu1 %v499_v10  ;;  %v749_v9 = vsel %vm609_vm3, %v605_v5, 0  ;;  %s1300_s25 = sshll.u32 %s1396_s1, 4  ;;  %s1301_s25 = int_to_ptr.vmem [resolvable:$false] %s1300_s25 }
  0xa6   : > { %1039 = vmatprep.mubr.msk.bf16.mxu0 %vm1395_vm0, %v1394_v0  ;;  %1045 = vmatprep.mubr.msk.bf16.mxu1 %vm1395_vm0, %v1394_v0  ;;  %p1298_p11 = pnand %p1297_p2, %p1851_p13  ;;  %s1302_s27 = scalar_lea.vmem %s1301_s25, 1024 }
  0xa7   : > { %1049 = vmatprep.subr.bf16.mxu0 %v1394_v0  ;;  %1055 = vmatprep.subr.bf16.mxu1 %v1394_v0  ;;  %p1303_p5 = scmp.lt.s32.totalorder %s1747_s21, %s1301_s25  ;;  %p1304_p10 = scmp.lt.s32.totalorder %s1302_s27, %s1296_s26 }
  0xa8   : > { %p1299_p0 = pneg %p1298_p11 }
  0xa9   : > { %p1305_p7 = por %p1304_p10, %p1303_p5 }
  0xab   : > { %p1306_p4 = pnand %p1305_p7, %p1299_p0 }
  0xac   : > { %1040 = vmatmul.mubr.msk.bf16.vlgmr.msra.gmra.mrb[4].mxu0 %vm356_vm1, %v350_v11  ;;  %1046 = vmatmul.mubr.msk.bf16.vlgmr.msra.gmra.mrb[4].mxu1 %vm356_vm1, %v351_v12 }
  0xad   : > { %1051 = vmatprep.mubr.msk.bf16.mxu0 %vm1395_vm0, %v1394_v0  ;;  %1057 = vmatprep.mubr.msk.bf16.mxu1 %vm1395_vm0, %v1394_v0 }
  0xae   : > { %1050 = vmatpush3.bf16.msra.mxu0 %v611_v48  ;;  %1056 = vmatpush3.bf16.msra.mxu1 %v657_v50 }
  0xaf   : > { %1061 = vmatprep.subr.bf16.mxu0 %v1394_v0  ;;  %1067 = vmatprep.subr.bf16.mxu1 %v1394_v0 }
 0x177   : > { %v397_v16 = vpop.f32.mrb[0].mxu0  ;;  %v443_v17 = vpop.f32.mrb[0].mxu1 }
 0x178   : > { %v541_v18 = vmul.f32 0.17677669, %v397_v16  ;;  %v1029_v19 = vpop.f32.mrb[1].mxu0  ;;  %v542_v20 = vmul.f32 0.17677669, %v443_v17  ;;  %v1035_v21 = vpop.f32.mrb[1].mxu1 }
 0x179   : > { %v400_v22 = vpop.f32.mrb[2].mxu0  ;;  %v446_v23 = vpop.f32.mrb[2].mxu1 }
 0x17a   : > { %v1030_v24 = vpop.f32.mrb[3].mxu0  ;;  %v1036_v25 = vpop.f32.mrb[3].mxu1  ;;  %v553_v26 = vadd.f32 %v1002_v14, %v541_v18  ;;  %v554_v27 = vadd.f32 %v1003_v15, %v542_v20 }
 0x17c   : > { %v558_v29 = vsel %vm557_vm2, %v553_v26, -inf  ;;  %v561_v30 = vsel %vm557_vm2, %v554_v27, -inf }
 0x17d   : > { %559 = vmax.xlane.f32.xlu0 %v558_v29 }
 0x17f   : > { %v489_v33 = vpop.f32.mrb[4].mxu0  ;;  %v535_v34 = vpop.f32.mrb[4].mxu1 }
 0x180   : > { %v543_v35 = vmul.f32 0.17677669, %v489_v33  ;;  %v1041_v36 = vpop.f32.mrb[5].mxu0  ;;  %v544_v37 = vmul.f32 0.17677669, %v535_v34  ;;  %v1047_v38 = vpop.f32.mrb[5].mxu1 }
 0x181   : > { %562 = vmax.xlane.f32.xlu0 %v561_v30  ;;  %v492_v39 = vpop.f32.mrb[6].mxu0  ;;  %v538_v40 = vpop.f32.mrb[6].mxu1 }
 0x182   : > { %v1042_v41 = vpop.f32.mrb[7].mxu0  ;;  %v1048_v42 = vpop.f32.mrb[7].mxu1  ;;  %v555_v43 = vadd.f32 %v1006_v31, %v543_v35  ;;  %v556_v44 = vadd.f32 %v1007_v32, %v544_v37 }
 0x184   : > { %v564_v45 = vsel %vm557_vm2, %v555_v43, -inf  ;;  %v567_v46 = vsel %vm557_vm2, %v556_v44, -inf }
 0x185   : > { %565 = vmax.xlane.f32.xlu1 %v564_v45 }
 0x189   : > { %568 = vmax.xlane.f32.xlu1 %v567_v46 }
 0x20a   : > { %v560_v51 = vpop.xlane.xlu0 %559 }
 0x20b   : > { %v570_v52 = vsub.f32 %v553_v26, %v560_v51 }
 0x20d   : > { %v574_v53 = vmul.f32 1.442695, %v570_v52 }
 0x20e   : > { %v563_v54 = vpop.xlane.xlu0 %562 }
 0x20f   : > { %1162 = vpow2.f32 %v574_v53  ;;  %v571_v55 = vsub.f32 %v554_v27, %v563_v54 }
 0x211   : > { %v576_v56 = vmul.f32 1.442695, %v571_v55 }
 0x212   : > { %v566_v57 = vpop.xlane.xlu1 %565 }
 0x213   : > { %1164 = vpow2.f32 %v576_v56  ;;  %v572_v58 = vsub.f32 %v555_v43, %v566_v57 }
 0x215   : > { %v578_v59 = vmul.f32 1.442695, %v572_v58 }
 0x216   : > { %v569_v60 = vpop.xlane.xlu1 %568 }
 0x217   : > { %1166 = vpow2.f32 %v578_v59  ;;  %v573_v61 = vsub.f32 %v556_v44, %v569_v60 }
 0x219   : > { %v1163_v63 = vpop.eup %1162  ;;  %v580_v1 = vmul.f32 1.442695, %v573_v61 }
 0x21a   : > { %v582_v2 = vsel %vm557_vm2, %v1163_v63, 0.0  ;;  %v598_v3 = vpack.c.bf16 %v1163_v63, %v1163_v63 }
 0x21b   : > { %1168 = vpow2.f32 %v580_v1  ;;  %583 = vadd.xlane.f32.xlu0 %v582_v2 }
 0x21c   : > { %1052 = vmatmul.mubr.msk.bf16.vlgmr.msra.gmra.mrb[8].mxu0 %vm557_vm2, %v598_v3 }
 0x21d   : > { %v1165_v6 = vpop.eup %1164  ;;  %1062 = vmatpush3.bf16.msra.mxu0 %v703_v4  ;;  %1063 = vmatprep.mubr.msk.bf16.mxu0 %vm1395_vm0, %v1394_v0 }
 0x21e   : > { %v585_v7 = vsel %vm557_vm2, %v1165_v6, 0.0  ;;  %v599_v8 = vpack.c.bf16 %v1165_v6, %v1165_v6 }
 0x21f   : > { %586 = vadd.xlane.f32.xlu1 %v585_v7 }
 0x220   : > { %1058 = vmatmul.mubr.msk.bf16.vlgmr.msra.gmra.mrb[8].mxu1 %vm557_vm2, %v599_v8 }
 0x221   : > { %v1167_v10 = vpop.eup %1166  ;;  %1068 = vmatpush3.bf16.msra.mxu1 %v749_v9  ;;  %1069 = vmatprep.mubr.msk.bf16.mxu1 %vm1395_vm0, %v1394_v0 }
 0x222   : > { %v588_v11 = vsel %vm557_vm2, %v1167_v10, 0.0  ;;  %v600_v12 = vpack.c.bf16 %v1167_v10, %v1167_v10 }
 0x223   : > { %589 = vadd.xlane.f32.xlu0 %v588_v11 }
 0x224   : > { %1064 = vmatmul.mubr.msk.bf16.vlgmr.msra.gmra.mrb[12].mxu0 %vm557_vm2, %v600_v12 }
 0x225   : > { %v1169_v13 = vpop.eup %1168 }
 0x226   : > { %v591_v14 = vsel %vm557_vm2, %v1169_v13, 0.0  ;;  %v601_v15 = vpack.c.bf16 %v1169_v13, %v1169_v13 }
 0x227   : > { %592 = vadd.xlane.f32.xlu1 %v591_v14 }
 0x228   : > { %1070 = vmatmul.mubr.msk.bf16.vlgmr.msra.gmra.mrb[12].mxu1 %vm557_vm2, %v601_v15 }
 0x2a8   : > { %v584_v16 = vpop.xlane.xlu0 %583 }
 0x2a9   : > { %1170 = vrcp.f32 %v584_v16 }
 0x2ac   : > { %v587_v17 = vpop.xlane.xlu1 %586 }
 0x2ad   : > { %1172 = vrcp.f32 %v587_v17 }
 0x2b0   : > { %v590_v18 = vpop.xlane.xlu0 %589 }
 0x2b1   : > { %1174 = vrcp.f32 %v590_v18 }
 0x2b3   : > { %v1171_v19 = vpop.eup %1170 }
 0x2b4   : > { %v593_v0 = vpop.xlane.xlu1 %592 }
 0x2b5   : > { %1176 = vrcp.f32 %v593_v0 }
 0x2b7   : > { %v1173_v25 = vpop.eup %1172 }
 0x2bb   : > { %v1175_v31 = vpop.eup %1174 }
 0x2bf   : > { %v1177_v37 = vpop.eup %1176 }
 0x2ef   : > { %v647_v20 = vpop.f32.mrb[8].mxu0 }
 0x2f0   : > { %v791_v21 = vmul.f32 %v1171_v19, %v647_v20  ;;  %v1053_v22 = vpop.f32.mrb[9].mxu0 }
 0x2f1   : > { %v650_v23 = vpop.f32.mrb[10].mxu0 }
 0x2f2   : > { %795 = vst.msk [vmem:[%s341_s22] sm:$0xff] %vm356_vm1, %v791_v21  ;;  %v1054_v24 = vpop.f32.mrb[11].mxu0 }
 0x2f3   : > { %v693_v26 = vpop.f32.mrb[8].mxu1 }
 0x2f4   : > { %v792_v27 = vmul.f32 %v1173_v25, %v693_v26  ;;  %v1059_v28 = vpop.f32.mrb[9].mxu1 }
 0x2f5   : > { %v696_v29 = vpop.f32.mrb[10].mxu1 }
 0x2f6   : > { %796 = vst.msk [vmem:[%s341_s22 + $0x8] sm:$0xff] %vm356_vm1, %v792_v27  ;;  %v1060_v30 = vpop.f32.mrb[11].mxu1 }
 0x2f7   : > { %v739_v32 = vpop.f32.mrb[12].mxu0 }
 0x2f8   : > { %v793_v33 = vmul.f32 %v1175_v31, %v739_v32  ;;  %v1065_v34 = vpop.f32.mrb[13].mxu0 }
 0x2f9   : > { %v742_v35 = vpop.f32.mrb[14].mxu0 }
 0x2fa   : > { %797 = vst.msk [vmem:[%s341_s22 + $0x10] sm:$0xff] %vm356_vm1, %v793_v33  ;;  %v1066_v36 = vpop.f32.mrb[15].mxu0 }
 0x2fb   : > { %v785_v38 = vpop.f32.mrb[12].mxu1 }
 0x2fc   : > { %v794_v39 = vmul.f32 %v1177_v37, %v785_v38  ;;  %v1071_v40 = vpop.f32.mrb[13].mxu1 }
 0x2fd   : > { %v788_v41 = vpop.f32.mrb[14].mxu1 }
 0x2fe   : > { %798 = vst.msk [vmem:[%s341_s22 + $0x18] sm:$0xff] %vm356_vm1, %v794_v39  ;;  %v1072_v42 = vpop.f32.mrb[15].mxu1 }
 0x2ff   : > { %1309 = shalt.err (!%p1306_p4)
}
 0x300   : > { %s1310_s0 = scalar_lea.hbm %s1753_s30, 512  ;;  %s1314_s14 = scalar_lea.hbm %s1807_s4, 1024 }
 0x301   : > { %p1311_p3 = scmp.ne.s32.totalorder %s1753_s30, %s1310_s0  ;;  %p1315_p8 = scmp.lt.u32.totalorder %s1753_s30, %s1807_s4 }
 0x302   : > { %p1316_p12 = scmp.lt.u32.totalorder %s1314_s14, %s1310_s0  ;;  %p1318_p2 = scmp.lt.u32.totalorder %s1310_s0, %s1753_s30 }
 0x303   : > { %p1312_p6 = pnand %p1311_p3, %p1851_p13 }
 0x304   : > { %p1317_p1 = por %p1316_p12, %p1315_p8 }
 0x305   : > { %p1313_p9 = pneg %p1312_p6 }
 0x306   : > { %p1319_p11 = por %p1318_p2, %p1317_p1 }
 0x308   : > { %p1320_p0 = pnand %p1319_p11, %p1313_p9 }
 0x30a   : > { %1323 = shalt.err (!%p1320_p0)
}
 0x30b   : > { %s1397_s28 = smov 128   ;;  %s1398_s9 = smov 8  }
 0x30c   : > { %1083 = dma.vmem_to_hbm [thread:$0]  (%p1851_p13), %s1747_s21, 512, %s1753_s30, %s800_s18, %s1397_s28, %s1397_s28, %s1398_s9  }
 0x30d PF: > { %s830_s23 = sand.u32 1, %s1366_s15   ;;  %p1852_p5 = scmp.ne.s32.totalorder %s1837_s8, 0 }
 0x30e   : > { %p1853_p10 = scmp.ge.s32.totalorder %s1386_s20, 2  ;;  %s831_s19 = scalar_lea.sflag [#allocation4], %s830_s23 }
 0x310   : > { %p1100_p7 = pnand %p1853_p10, %p1852_p5 }
 0x312   : > { %1361 = dma.done.wait (!%p1100_p7), %s831_s19, 512  }
 0x313   : > { %1363 = vsyncadd (!%p1100_p7), %s831_s19, 4294966784  ;;  %s24_s20 = sadd.s32 1, %s1386_s20   ;;  %s1854_s13 = sld [smem:[#allocation15_spill]] }
 0x314   : > { %p21_p4 = scmp.ge.s32.totalorder %s24_s20, 4   ;;  %s1855_s17 = sld [smem:[#allocation18_spill]] }
 0x315   : > { %s1856_s18 = sld [smem:[#allocation16_spill]]  ;;  %s1857_s19 = sld [smem:[#allocation17_spill]] }
 0x316   : > { %s1858_s15 = smov %s1370_s16  ;;  %23 = sbr.rel (!%p21_p4) target bundleno = 12 (0xc), region = 110 }
 0x319   : > { %s1859_s16 = smov %s1854_s13 }
 0x31d   :  { %836 = vsyncpa [#allocation3], 1 }
 0x31e   :  { %838 = vsyncpa [#allocation3 + $0x1], 1 }
 0x31f   :  { %839 = vsyncpa [#allocation6], 1 }
 0x320   :  { %841 = vsyncpa [#allocation6 + $0x1], 1 }
 0x321   :  { %842 = vsyncpa [#allocation9], 1 }
 0x322   :  { %843 = vsyncpa [#allocation4], 1 }
 0x323   :  { %845 = vsyncpa [#allocation4 + $0x1], 1 }

</bundles_post_ra>
